<compile_context>
chip_gen: v5e
topology: v5e:2x2
jax: 0.10.0
libtpu: 0.0.40
codegen_flags: <defaults>
</compile_context>

<pallas_src>
import jax
import jax.numpy as jnp
from jax.experimental import pallas as pl
from jax.experimental.pallas import tpu as pltpu

_TARGET_BLOCK_BYTES = 4 << 20   # ~4 MiB per block: 4 live buffers ~= 16 MiB VMEM
_FAST_PATH_BYTES = 2 << 20      # below this, run as one whole-array block (no grid)
_VMEM_LIMIT_BYTES = 48 << 20    # raise scoped VMEM (v5e default 16 MiB); < v7x 64 MiB physical


def _cdiv(a, b):
    return -(-a // b)


def _round_up(a, m):
    return _cdiv(a, m) * m


def _elementwise_kernel(x_ref, o_ref):
    # (x + 2) + (x * 3) - (x - 1) * (x / 2)  ==  2 + 4.5*x - 0.5*x*x
    x = x_ref[...]
    o_ref[...] = 2.0 + x * 4.5 - (x * x) * 0.5


def _pick_cols(n):
    """Largest lane width in {512,256,128} dividing n (pad only in fallback)."""
    for c in (512, 256, 128):
        if n % c == 0:
            return c, 0
    return 128, _round_up(n, 128) - n


def _cost(n):
    # memory-bound streaming op: read + write n f32 elements, a few VALU ops each
    return pl.CostEstimate(flops=5 * n, transcendentals=0, bytes_accessed=8 * n)


@jax.jit
def pt_module_forward(x):
    """Pallas TPU implementation of PtModule.forward."""
    n = x.size
    nbytes = n * x.dtype.itemsize

    # ---- small-input fast path: one block, no grid, no pad/slice copies ----
    if nbytes <= _FAST_PATH_BYTES:
        if n % 128 == 0:
            cols, _ = _pick_cols(n)
            x2d = x.reshape(n // cols, cols)  # contiguous reshape -> bitcast under jit
            out = pl.pallas_call(
                _elementwise_kernel,
                out_shape=jax.ShapeDtypeStruct(x2d.shape, x.dtype),
                cost_estimate=_cost(n),
            )(x2d)
            return out.reshape(x.shape)
        # full-array block bypasses the (8,128) constraint; masked stores are
        # irrelevant at this size.
        return pl.pallas_call(
            _elementwise_kernel,
            out_shape=jax.ShapeDtypeStruct(x.shape, x.dtype),
            cost_estimate=_cost(n),
        )(x)

    # ---- large-input slab path: lane-dense (rows, cols), tiled 1-D grid ----
    cols, pad = _pick_cols(n)
    rows = _cdiv(n, cols)

    target_block_rows = max(8, (_TARGET_BLOCK_BYTES // (cols * x.dtype.itemsize)) // 8 * 8)
    # guarantee >= 2 grid programs so v7x's two TensorCores both get work
    block_rows = min(target_block_rows, _round_up(_cdiv(rows, 2), 8))
    num_blocks = _cdiv(rows, block_rows)
    # prefer an even program count on v7x when it costs nothing
    if num_blocks > 2 and num_blocks % 2:
        br2 = _round_up(_cdiv(rows, num_blocks + 1), 8)
        if br2 >= 8 and _cdiv(rows, br2) % 2 == 0:
            block_rows, num_blocks = br2, _cdiv(rows, br2)

    xf = x.reshape(-1)
    if pad:
        xf = jnp.pad(xf, (0, pad))  # rare: only when n is not a multiple of 128
    x2d = xf.reshape(rows, cols)

    out2d = pl.pallas_call(
        _elementwise_kernel,
        out_shape=jax.ShapeDtypeStruct((rows, cols), x.dtype),
        grid=(num_blocks,),
        in_specs=[pl.BlockSpec((block_rows, cols), lambda i: (i, 0))],
        out_specs=pl.BlockSpec((block_rows, cols), lambda i: (i, 0)),
        # only alias when the padded copy is a fresh buffer (safe to clobber)
        input_output_aliases=({0: 0} if pad else {}),
        cost_estimate=_cost(rows * cols),
        compiler_params=pltpu.CompilerParams(
            dimension_semantics=("parallel",),
            vmem_limit_bytes=_VMEM_LIMIT_BYTES,
        ),
    )(x2d)

    out = out2d.reshape(-1)
    if pad:
        out = out[:n]
    return out.reshape(x.shape)


def _reference(x):
    x1 = x + 2.0
    x2 = x * 3.0
    x3 = x - 1.0
    x4 = x / 2.0
    return x1 + x2 - x3 * x4


if __name__ == "__main__":
    key = jax.random.PRNGKey(0)
    x = jax.random.normal(key, (2, 4, 16, 16), dtype=jnp.float32)

    out = jax.block_until_ready(pt_module_forward(x))

    ref = _reference(x)
    assert out.shape == ref.shape and out.dtype == ref.dtype
    assert jnp.allclose(out, ref, atol=1e-5, rtol=1e-5)

    print("KERNEL_OK")
</pallas_src>

<mosaic_0001>
module attributes {stable_mosaic.version = 11 : i64} {
  func.func @_elementwise_kernel(%arg0: memref<4x512xf32, #tpu.memory_space<vmem>>, %arg1: memref<4x512xf32, #tpu.memory_space<vmem>>) attributes {dimension_semantics = [], scalar_prefetch = 0 : i64, scratch_operands = 0 : i64, tpu.core_type = #tpu.core_type<tc>} {
    %c0 = arith.constant 0 : index
    %c0_0 = arith.constant 0 : index
    %0 = vector.load %arg0[%c0, %c0_0] : memref<4x512xf32, #tpu.memory_space<vmem>>, vector<4x512xf32>
    %cst = arith.constant 4.500000e+00 : f32
    %1 = vector.broadcast %cst : f32 to vector<4x512xf32>
    %2 = arith.mulf %0, %1 : vector<4x512xf32>
    %cst_1 = arith.constant 2.000000e+00 : f32
    %3 = vector.broadcast %cst_1 : f32 to vector<4x512xf32>
    %4 = arith.addf %3, %2 : vector<4x512xf32>
    %5 = arith.mulf %0, %0 : vector<4x512xf32>
    %cst_2 = arith.constant 5.000000e-01 : f32
    %6 = vector.broadcast %cst_2 : f32 to vector<4x512xf32>
    %7 = arith.mulf %5, %6 : vector<4x512xf32>
    %8 = arith.subf %4, %7 : vector<4x512xf32>
    %c0_3 = arith.constant 0 : index
    %c0_4 = arith.constant 0 : index
    %9 = vector.load %arg1[%c0_3, %c0_4] : memref<4x512xf32, #tpu.memory_space<vmem>>, vector<4x512xf32>
    tpu.vector_store %arg1[%c0_3, %c0_4], %8 {strides = array<i32>} : memref<4x512xf32, #tpu.memory_space<vmem>>, vector<4x512xf32>,
    return
  }
}

</mosaic_0001>

<bundles_post_ra>
// kernel: pt_module_forward.1
= control target key start
LH: loop header
LB: loop body
LE: loop exit
PB: predicated region body
PF: predicated region fallthrough
CT: control target
= control target key end

     0   :  { %s48_s0 = inlined_call_operand.vmem [shape: f32[4,512], index: 0, kind: input, shape index: {}]   ;;  %s49_s1 = inlined_call_operand.vmem [shape: f32[4,512], index: 1, kind: output, shape index: {}]  }
   0x1   :  { %v8_v0 = vld [vmem:[%s48_s0] sm:$0xff]  ;;  %v9_v1 = vld [vmem:[%s48_s0 + $0x8] sm:$0xff] }
   0x2   :  { %v10_v2 = vmul.f32 4.5, %v8_v0  ;;  %v14_v3 = vmul.f32 %v8_v0, %v8_v0  ;;  %v11_v4 = vmul.f32 4.5, %v9_v1  ;;  %v15_v5 = vmul.f32 %v9_v1, %v9_v1 }
   0x4   :  { %v12_v6 = vadd.f32 2.0, %v10_v2  ;;  %v16_v7 = vmul.f32 0.5, %v14_v3  ;;  %v13_v8 = vadd.f32 2.0, %v11_v4  ;;  %v17_v9 = vmul.f32 0.5, %v15_v5 }
   0x6   :  { %v18_v10 = vsub.f32 %v12_v6, %v16_v7  ;;  %v19_v11 = vsub.f32 %v13_v8, %v17_v9 }
   0x8   :  { %20 = vst [vmem:[%s49_s1] sm:$0xff] %v18_v10 }
   0x9   :  { %21 = vst [vmem:[%s49_s1 + $0x8] sm:$0xff] %v19_v11 }

</bundles_post_ra>
